<compile_context>
chip_gen: v6e
topology: v6e:2x2x1
jax: 0.10.0
libtpu: 0.0.40
codegen_flags: <defaults>
</compile_context>

<pallas_src>
import numpy as np
import jax
import jax.numpy as jnp
from jax.experimental import pallas as pl
from jax.experimental.pallas import tpu as pltpu


def _round_up(x, m):
    return ((x + m - 1) // m) * m


# ----------------------------------------------------------------------------
# Deterministic parameter construction (librosa slaney mel filterbank + hann)
# ----------------------------------------------------------------------------
def _hz_to_mel(f):
    f = np.asarray(f, dtype=np.float64)
    f_sp = 200.0 / 3
    mels = f / f_sp
    min_log_hz = 1000.0
    min_log_mel = min_log_hz / f_sp
    logstep = np.log(6.4) / 27.0
    return np.where(f >= min_log_hz,
                    min_log_mel + np.log(np.maximum(f, 1e-10) / min_log_hz) / logstep,
                    mels)


def _mel_to_hz(m):
    m = np.asarray(m, dtype=np.float64)
    f_sp = 200.0 / 3
    freqs = m * f_sp
    min_log_hz = 1000.0
    min_log_mel = min_log_hz / f_sp
    logstep = np.log(6.4) / 27.0
    return np.where(m >= min_log_mel,
                    min_log_hz * np.exp(logstep * (m - min_log_mel)),
                    freqs)


def librosa_mel_fn(sr, n_fft, n_mels, fmin, fmax):
    """Slaney-style mel filterbank matching librosa.filters.mel defaults."""
    if fmax is None:
        fmax = sr / 2.0
    n_freq = 1 + n_fft // 2
    fftfreqs = np.linspace(0.0, sr / 2.0, n_freq)
    mel_pts = _mel_to_hz(np.linspace(_hz_to_mel(fmin), _hz_to_mel(fmax), n_mels + 2))
    fdiff = np.diff(mel_pts)
    ramps = mel_pts[:, None] - fftfreqs[None, :]
    lower = -ramps[:-2] / fdiff[:-1, None]
    upper = ramps[2:] / fdiff[1:, None]
    weights = np.maximum(0.0, np.minimum(lower, upper))
    enorm = 2.0 / (mel_pts[2:n_mels + 2] - mel_pts[:n_mels])
    weights *= enorm[:, None]
    return weights.astype(np.float32)                      # (n_mels, n_freq)


def hann_window(win_length):
    # torch.hann_window default (periodic=True)
    n = np.arange(win_length, dtype=np.float64)
    return 0.5 * (1.0 - np.cos(2.0 * np.pi * n / win_length))


def windowed_dft_matrix_packed(n_fft, win_length):
    """Hann window folded into the one-sided DFT, packed to N = n_fft columns.

    Column layout (n_half = n_fft // 2):
      cols [0, n_half)      -> window * cos(2*pi*n*k/n_fft),  k = 0..n_half-1
      col  n_half           -> window * cos(pi*n)             (real Nyquist bin)
      cols (n_half, n_fft)  -> -window * sin(2*pi*n*k/n_fft), k = 1..n_half-1
    The imaginary DC and Nyquist columns are identically zero, so they are dropped
    and the real Nyquist column takes the imag-DC slot (fixed up in the kernel).
    """
    n_half = n_fft // 2
    w = np.zeros(n_fft, dtype=np.float64)
    off = (n_fft - win_length) // 2                        # torch.stft window centering
    w[off:off + win_length] = hann_window(win_length)
    n = np.arange(n_fft, dtype=np.float64)[:, None]
    k_re = np.arange(n_half, dtype=np.float64)[None, :]
    k_im = np.arange(1, n_half, dtype=np.float64)[None, :]
    out = np.zeros((n_fft, n_fft), dtype=np.float64)
    out[:, :n_half] = w[:, None] * np.cos(2.0 * np.pi * n * k_re / n_fft)
    out[:, n_half] = w * np.cos(np.pi * n[:, 0])
    out[:, n_half + 1:] = -w[:, None] * np.sin(2.0 * np.pi * n * k_im / n_fft)
    return out.astype(np.float32)                          # (n_fft, n_fft)


def _default_tiling():
    """Pick (frames_tile, vmem_limit_bytes) per TPU generation."""
    vmem_cap = 64 * 1024 * 1024
    try:
        info = pltpu.get_tpu_info()
        vmem_cap = int(getattr(info, "vmem_capacity_bytes", vmem_cap))
    except Exception:
        pass
    if vmem_cap >= 100 * 1024 * 1024:       # v5e / v6e: 128 MiB physical VMEM
        return 1024, 96 * 1024 * 1024
    return 512, 48 * 1024 * 1024            # v7x: 64 MiB physical VMEM


# ----------------------------------------------------------------------------
# Pallas kernel: accumulated shifted windowed-DFT matmuls -> power -> mel -> log10
# ----------------------------------------------------------------------------
def _make_kernel(tf, r, hop, n_half, matmul_dtype, with_power):
    def kernel(win_ref, dft_ref, melT_ref, melcorr_ref, mel_ref, *rest):
        rows = win_ref[0, 0, :, :]                                   # (tf+extra, hop) f32

        # Windowed one-sided DFT as r accumulated shifted matmuls (f32 accumulation):
        #   spec[t] = sum_j rows[t + j] @ dft[j*hop:(j+1)*hop]   (hop | n_fft)
        spec = jnp.dot(rows[0:tf, :].astype(matmul_dtype), dft_ref[0:hop, :],
                       preferred_element_type=jnp.float32)           # (tf, n_fft)
        for j in range(1, r):
            spec = spec + jnp.dot(rows[j:j + tf, :].astype(matmul_dtype),
                                  dft_ref[j * hop:(j + 1) * hop, :],
                                  preferred_element_type=jnp.float32)

        re = spec[:, :n_half]                  # real, k = 0..n_half-1
        iq = spec[:, n_half:]                  # [real Nyquist, imag k = 1..n_half-1]
        pw = re * re + iq * iq                 # (tf, n_half); col 0 = re0^2 + nyq^2 (fixed below)
        nyq2 = iq[:, 0:1] * iq[:, 0:1]         # (tf, 1) real-Nyquist power

        # Mel projection over k = 0..n_half-1, plus one rank-1 fix-up that removes the
        # spurious nyq^2 contribution through mel row 0 and adds the true Nyquist row.
        mel = jnp.dot(pw, melT_ref[...], preferred_element_type=jnp.float32)
        mel = mel + nyq2 * melcorr_ref[...]                           # (tf, n_mel_pad)
        mel_ref[0] = jnp.log10(jnp.maximum(mel, 1e-5))

        if with_power:
            lane = jax.lax.broadcasted_iota(jnp.int32, (tf, n_half), 1)
            p_fix = jnp.where(lane == 0, re[:, 0:1] * re[:, 0:1], pw)     # correct k=0 column
            lane_hi = jax.lax.broadcasted_iota(jnp.int32, (tf, 128), 1)
            p_hi = jnp.where(lane_hi == 0, nyq2, 0.0)                      # k = n_half column
            p_full = jnp.concatenate([p_fix, p_hi], axis=1)                # (tf, n_half+128)
            rest[0][0] = jnp.log10(jnp.maximum(p_full, 1e-5))
    return kernel


class Audio2Mel:
    def __init__(self, n_fft=1024, hop_length=256, win_length=1024,
                 sampling_rate=22050, n_mel_channels=80, mel_fmin=0.0, mel_fmax=None,
                 matmul_dtype=jnp.bfloat16, frames_tile=None, vmem_limit_bytes=None):
        assert n_fft % hop_length == 0, "in-kernel framing requires hop_length | n_fft"
        assert win_length <= n_fft
        assert (n_fft // 2) % 128 == 0, "packed DFT layout requires n_fft % 256 == 0"
        self.n_fft = n_fft
        self.hop_length = hop_length
        self.win_length = win_length
        self.sampling_rate = sampling_rate
        self.n_mel_channels = n_mel_channels
        self.n_half = n_fft // 2
        self.n_freq = self.n_half + 1
        self.n_freq_pad = self.n_half + 128            # lane-dense padded power-spec width
        self.n_mel_pad = _round_up(n_mel_channels, 128)
        self.r = n_fft // hop_length
        self.matmul_dtype = matmul_dtype

        auto_tf, auto_vmem = _default_tiling()
        self.frames_tile = frames_tile if frames_tile is not None else auto_tf
        self.vmem_limit_bytes = vmem_limit_bytes if vmem_limit_bytes is not None else auto_vmem

        # Hann window folded into the packed (real || Nyquist-in-imag-DC || imag) DFT.
        self.dft = jnp.asarray(windowed_dft_matrix_packed(n_fft, win_length),
                               dtype=matmul_dtype)                    # (n_fft, n_fft)

        mel_basis = librosa_mel_fn(sr=sampling_rate, n_fft=n_fft,
                                   n_mels=n_mel_channels, fmin=mel_fmin, fmax=mel_fmax)
        melT = np.zeros((self.n_half, self.n_mel_pad), dtype=np.float32)
        melT[:, :n_mel_channels] = mel_basis.T[:self.n_half]
        self.melT = jnp.asarray(melT)                                  # (n_half, n_mel_pad) f32
        melcorr = np.zeros((1, self.n_mel_pad), dtype=np.float32)
        melcorr[0, :n_mel_channels] = mel_basis[:, self.n_half] - mel_basis[:, 0]
        self.melcorr = jnp.asarray(melcorr)                            # (1, n_mel_pad) f32

    def __call__(self, audioin, return_power_spec=False):
        # audioin: (B, 1, T) float32 (PyTorch NCL layout)
        B = audioin.shape[0]
        T = audioin.shape[-1]
        n_fft, hop, r = self.n_fft, self.hop_length, self.r
        n_half, n_freq_pad, n_mel_pad = self.n_half, self.n_freq_pad, self.n_mel_pad

        p = (n_fft - hop) // 2
        audio = jnp.pad(audioin[:, 0, :], ((0, 0), (p, p)), mode="reflect")   # (B, L)
        L = T + 2 * p
        n_frames = 1 + (L - n_fft) // hop

        extra = _round_up(max(r - 1, 1), 8)                 # look-ahead rows per tile
        tf = int(min(self.frames_tile, _round_up(n_frames, 8)))
        tf = max(_round_up(tf, 8), extra)
        n_tiles = pl.cdiv(n_frames, tf)
        n_frames_pad = n_tiles * tf
        n_rows = n_frames_pad + extra
        L_need = n_rows * hop
        if L_need > L:
            audio = jnp.pad(audio, ((0, 0), (0, L_need - L)))
        elif L_need < L:
            audio = audio[:, :L_need]
        rows = audio.reshape(B, n_rows, hop)                # cheap reshape, ~1x audio bytes

        # Per-tile overlapping row windows: tile f covers rows [f*tf, f*tf + tf + extra).
        # Only `extra` rows per tile are duplicated (~1-2% extra HBM traffic).
        main = rows[:, :n_frames_pad].reshape(B, n_tiles, tf, hop)
        tail_last = rows[:, n_frames_pad:n_rows][:, None]               # (B, 1, extra, hop)
        if n_tiles > 1:
            tails = jnp.concatenate([main[:, 1:, :extra, :], tail_last], axis=1)
        else:
            tails = tail_last
        windows = jnp.concatenate([main, tails], axis=2)                 # (B, n_tiles, tf+extra, hop)

        kernel = _make_kernel(tf, r, hop, n_half, self.matmul_dtype, return_power_spec)

        out_shapes = [jax.ShapeDtypeStruct((B, n_frames_pad, n_mel_pad), jnp.float32)]
        out_specs = [pl.BlockSpec((1, tf, n_mel_pad), lambda b, f: (b, f, 0))]
        if return_power_spec:
            out_shapes.append(jax.ShapeDtypeStruct((B, n_frames_pad, n_freq_pad), jnp.float32))
            out_specs.append(pl.BlockSpec((1, tf, n_freq_pad), lambda b, f: (b, f, 0)))

        outs = pl.pallas_call(
            kernel,
            out_shape=tuple(out_shapes),
            grid_spec=pltpu.PrefetchScalarGridSpec(
                num_scalar_prefetch=0,
                grid=(B, n_tiles),
                in_specs=[
                    pl.BlockSpec((1, 1, tf + extra, hop), lambda b, f: (b, f, 0, 0)),
                    pl.BlockSpec((n_fft, n_fft), lambda b, f: (0, 0)),
                    pl.BlockSpec((n_half, n_mel_pad), lambda b, f: (0, 0)),
                    pl.BlockSpec((1, n_mel_pad), lambda b, f: (0, 0)),
                ],
                out_specs=tuple(out_specs),
            ),
            compiler_params=pltpu.CompilerParams(
                dimension_semantics=("parallel", "parallel"),
                vmem_limit_bytes=self.vmem_limit_bytes,
            ),
        )(windows, self.dft, self.melT, self.melcorr)

        logmel = outs[0]
        # Back to PyTorch layout: (B, n_mel, n_frames); only the small mel tensor by default.
        log_mel_spec = jnp.transpose(logmel[:, :n_frames, :self.n_mel_channels], (0, 2, 1))
        if return_power_spec:
            log_power_spec = jnp.transpose(outs[1][:, :n_frames, :self.n_freq], (0, 2, 1))
            return log_mel_spec, log_power_spec
        return log_mel_spec


if __name__ == "__main__":
    # Small, module-consistent shapes: B=2 waveforms of length 1024, n_fft=256, hop=64, 32 mels.
    B, T = 2, 1024
    key = jax.random.PRNGKey(0)
    x = jax.random.normal(key, (B, 1, T), dtype=jnp.float32)

    a2m = Audio2Mel(n_fft=256, hop_length=64, win_length=256,
                    sampling_rate=16000, n_mel_channels=32, mel_fmin=0.0, mel_fmax=None)

    # Default path (no power spec output compiled or written back).
    log_mel_only = a2m(x)
    jax.block_until_ready(log_mel_only)
    assert log_mel_only.shape == (B, 32, 16), log_mel_only.shape
    assert bool(jnp.all(jnp.isfinite(log_mel_only)))

    # Power-spec path.
    log_mel, log_pow = a2m(x, return_power_spec=True)
    jax.block_until_ready((log_mel, log_pow))
    assert log_mel.shape == (B, 32, 16), log_mel.shape
    assert log_pow.shape == (B, 129, 16), log_pow.shape
    assert bool(jnp.all(jnp.isfinite(log_mel))) and bool(jnp.all(jnp.isfinite(log_pow)))

    print("KERNEL_OK")
</pallas_src>

<mosaic_0001>
module attributes {stable_mosaic.version = 11 : i64} {
  func.func @kernel(%arg0: i32, %arg1: i32, %arg2: memref<1x1x24x64xf32, #tpu.memory_space<vmem>>, %arg3: memref<256x256xbf16, #tpu.memory_space<vmem>>, %arg4: memref<128x128xf32, #tpu.memory_space<vmem>>, %arg5: memref<1x128xf32, #tpu.memory_space<vmem>>, %arg6: memref<1x16x128xf32, #tpu.memory_space<vmem>>) attributes {dimension_semantics = [#tpu.dimension_semantics<parallel>, #tpu.dimension_semantics<parallel>], iteration_bounds = array<i64: 2, 1>, scalar_prefetch = 0 : i64, scratch_operands = 0 : i64, tpu.core_type = #tpu.core_type<tc>, window_params = [{transform_indices = @transform_0, window_bounds = array<i64: 1, 1, 24, 64>}, {pipeline_mode = #tpu.pipeline_mode<synchronous>, transform_indices = @transform_1, window_bounds = array<i64: 256, 256>}, {pipeline_mode = #tpu.pipeline_mode<synchronous>, transform_indices = @transform_2, window_bounds = array<i64: 128, 128>}, {pipeline_mode = #tpu.pipeline_mode<synchronous>, transform_indices = @transform_3, window_bounds = array<i64: 1, 128>}, {transform_indices = @transform_4, window_bounds = array<i64: 1, 16, 128>}]} {
    %c0 = arith.constant 0 : index
    %c0_0 = arith.constant 0 : index
    %c0_1 = arith.constant 0 : index
    %c0_2 = arith.constant 0 : index
    %0 = vector.load %arg2[%c0, %c0_0, %c0_1, %c0_2] : memref<1x1x24x64xf32, #tpu.memory_space<vmem>>, vector<1x1x24x64xf32>
    %1 = vector.shape_cast %0 : vector<1x1x24x64xf32> to vector<24x64xf32>
    %2 = vector.extract_strided_slice %1 {offsets = [0, 0], sizes = [16, 64], strides = [1, 1]} : vector<24x64xf32> to vector<16x64xf32>
    %3 = arith.truncf %2 : vector<16x64xf32> to vector<16x64xbf16>
    %c0_3 = arith.constant 0 : index
    %c0_4 = arith.constant 0 : index
    %4 = vector.load %arg3[%c0_3, %c0_4] : memref<256x256xbf16, #tpu.memory_space<vmem>>, vector<64x256xbf16>
    %cst = arith.constant dense<0.000000e+00> : vector<16x256xf32>
    %5 = tpu.matmul %3, %4, %cst {dimension_numbers = #tpu.dot_dimension_numbers<[1], [0], [0], [1], [0, 0, 1, 1], [], []>} : vector<16x64xbf16>, vector<64x256xbf16>, vector<16x256xf32> -> vector<16x256xf32>
    %6 = vector.extract_strided_slice %1 {offsets = [1, 0], sizes = [16, 64], strides = [1, 1]} : vector<24x64xf32> to vector<16x64xf32>
    %7 = arith.truncf %6 : vector<16x64xf32> to vector<16x64xbf16>
    %c64 = arith.constant 64 : index
    %c0_5 = arith.constant 0 : index
    %8 = vector.load %arg3[%c64, %c0_5] : memref<256x256xbf16, #tpu.memory_space<vmem>>, vector<64x256xbf16>
    %cst_6 = arith.constant dense<0.000000e+00> : vector<16x256xf32>
    %9 = tpu.matmul %7, %8, %cst_6 {dimension_numbers = #tpu.dot_dimension_numbers<[1], [0], [0], [1], [0, 0, 1, 1], [], []>} : vector<16x64xbf16>, vector<64x256xbf16>, vector<16x256xf32> -> vector<16x256xf32>
    %10 = arith.addf %5, %9 : vector<16x256xf32>
    %11 = vector.extract_strided_slice %1 {offsets = [2, 0], sizes = [16, 64], strides = [1, 1]} : vector<24x64xf32> to vector<16x64xf32>
    %12 = arith.truncf %11 : vector<16x64xf32> to vector<16x64xbf16>
    %c128 = arith.constant 128 : index
    %c0_7 = arith.constant 0 : index
    %13 = vector.load %arg3[%c128, %c0_7] : memref<256x256xbf16, #tpu.memory_space<vmem>>, vector<64x256xbf16>
    %cst_8 = arith.constant dense<0.000000e+00> : vector<16x256xf32>
    %14 = tpu.matmul %12, %13, %cst_8 {dimension_numbers = #tpu.dot_dimension_numbers<[1], [0], [0], [1], [0, 0, 1, 1], [], []>} : vector<16x64xbf16>, vector<64x256xbf16>, vector<16x256xf32> -> vector<16x256xf32>
    %15 = arith.addf %10, %14 : vector<16x256xf32>
    %16 = vector.extract_strided_slice %1 {offsets = [3, 0], sizes = [16, 64], strides = [1, 1]} : vector<24x64xf32> to vector<16x64xf32>
    %17 = arith.truncf %16 : vector<16x64xf32> to vector<16x64xbf16>
    %c192 = arith.constant 192 : index
    %c0_9 = arith.constant 0 : index
    %18 = vector.load %arg3[%c192, %c0_9] : memref<256x256xbf16, #tpu.memory_space<vmem>>, vector<64x256xbf16>
    %cst_10 = arith.constant dense<0.000000e+00> : vector<16x256xf32>
    %19 = tpu.matmul %17, %18, %cst_10 {dimension_numbers = #tpu.dot_dimension_numbers<[1], [0], [0], [1], [0, 0, 1, 1], [], []>} : vector<16x64xbf16>, vector<64x256xbf16>, vector<16x256xf32> -> vector<16x256xf32>
    %20 = arith.addf %15, %19 : vector<16x256xf32>
    %21 = vector.extract_strided_slice %20 {offsets = [0, 0], sizes = [16, 128], strides = [1, 1]} : vector<16x256xf32> to vector<16x128xf32>
    %22 = vector.extract_strided_slice %20 {offsets = [0, 128], sizes = [16, 128], strides = [1, 1]} : vector<16x256xf32> to vector<16x128xf32>
    %23 = arith.mulf %21, %21 : vector<16x128xf32>
    %24 = arith.mulf %22, %22 : vector<16x128xf32>
    %25 = arith.addf %23, %24 : vector<16x128xf32>
    %26 = vector.extract_strided_slice %22 {offsets = [0, 0], sizes = [16, 1], strides = [1, 1]} : vector<16x128xf32> to vector<16x1xf32>
    %27 = vector.extract_strided_slice %22 {offsets = [0, 0], sizes = [16, 1], strides = [1, 1]} : vector<16x128xf32> to vector<16x1xf32>
    %28 = arith.mulf %26, %27 : vector<16x1xf32>
    %c0_11 = arith.constant 0 : index
    %c0_12 = arith.constant 0 : index
    %29 = vector.load %arg4[%c0_11, %c0_12] : memref<128x128xf32, #tpu.memory_space<vmem>>, vector<128x128xf32>
    %cst_13 = arith.constant dense<0.000000e+00> : vector<16x128xf32>
    %30 = tpu.matmul %25, %29, %cst_13 {dimension_numbers = #tpu.dot_dimension_numbers<[1], [0], [0], [1], [0, 0, 1, 1], [], []>} : vector<16x128xf32>, vector<128x128xf32>, vector<16x128xf32> -> vector<16x128xf32>
    %c0_14 = arith.constant 0 : index
    %c0_15 = arith.constant 0 : index
    %31 = vector.load %arg5[%c0_14, %c0_15] : memref<1x128xf32, #tpu.memory_space<vmem>>, vector<1x128xf32>
    %32 = vector.broadcast %28 : vector<16x1xf32> to vector<16x128xf32>
    %33 = vector.broadcast %31 : vector<1x128xf32> to vector<16x128xf32>
    %34 = arith.mulf %32, %33 : vector<16x128xf32>
    %35 = arith.addf %30, %34 : vector<16x128xf32>
    %cst_16 = arith.constant 9.99999974E-6 : f32
    %36 = vector.broadcast %cst_16 : f32 to vector<16x128xf32>
    %37 = arith.maximumf %35, %36 : vector<16x128xf32>
    %38 = math.log %37 : vector<16x128xf32>
    %cst_17 = arith.constant 0.434294492 : f32
    %39 = vector.broadcast %cst_17 : f32 to vector<16x128xf32>
    %40 = arith.mulf %38, %39 : vector<16x128xf32>
    %c0_18 = arith.constant 0 : index
    %c0_19 = arith.constant 0 : index
    %c0_20 = arith.constant 0 : index
    %41 = vector.load %arg6[%c0_18, %c0_19, %c0_20] : memref<1x16x128xf32, #tpu.memory_space<vmem>>, vector<1x16x128xf32>
    %42 = vector.shape_cast %41 : vector<1x16x128xf32> to vector<16x128xf32>
    %43 = vector.shape_cast %40 : vector<16x128xf32> to vector<1x16x128xf32>
    tpu.vector_store %arg6[%c0_18, %c0_19, %c0_20], %43 {strides = array<i32>} : memref<1x16x128xf32, #tpu.memory_space<vmem>>, vector<1x16x128xf32>,
    return
  }
  func.func @transform_0(%arg0: i32, %arg1: i32) -> (i32, i32, i32, i32) {
    %c0_i32 = arith.constant 0 : i32
    %c0_i32_0 = arith.constant 0 : i32
    %c0_i32_1 = arith.constant 0 : i32
    return %arg0, %arg1, %c0_i32, %c0_i32_0 : i32, i32, i32, i32
  }
  func.func @transform_1(%arg0: i32, %arg1: i32) -> (i32, i32) {
    %c0_i32 = arith.constant 0 : i32
    %c0_i32_0 = arith.constant 0 : i32
    %c0_i32_1 = arith.constant 0 : i32
    return %c0_i32, %c0_i32_0 : i32, i32
  }
  func.func @transform_2(%arg0: i32, %arg1: i32) -> (i32, i32) {
    %c0_i32 = arith.constant 0 : i32
    %c0_i32_0 = arith.constant 0 : i32
    %c0_i32_1 = arith.constant 0 : i32
    return %c0_i32, %c0_i32_0 : i32, i32
  }
  func.func @transform_3(%arg0: i32, %arg1: i32) -> (i32, i32) {
    %c0_i32 = arith.constant 0 : i32
    %c0_i32_0 = arith.constant 0 : i32
    %c0_i32_1 = arith.constant 0 : i32
    return %c0_i32, %c0_i32_0 : i32, i32
  }
  func.func @transform_4(%arg0: i32, %arg1: i32) -> (i32, i32, i32) {
    %c0_i32 = arith.constant 0 : i32
    %c0_i32_0 = arith.constant 0 : i32
    return %arg0, %arg1, %c0_i32 : i32, i32, i32
  }
}

</mosaic_0001>

<bundles_post_ra>
// kernel: tpu_custom_call.1
= control target key start
LH: loop header
LB: loop body
LE: loop exit
PB: predicated region body
PF: predicated region fallthrough
CT: control target
= control target key end

     0   :  { %s1605_s0 = inlined_call_operand.hbm [shape: f32[2,1,24,64], index: 0, kind: input, shape index: {}]   ;;  %s1606_s1 = inlined_call_operand.hbm [shape: bf16[256,256], index: 1, kind: input, shape index: {}]   ;;  %s1607_s2 = inlined_call_operand.hbm [shape: f32[128,128], index: 2, kind: input, shape index: {}]   ;;  %s1608_s3 = inlined_call_operand.vmem [shape: f32[1,128], index: 3, kind: input, shape index: {}]   ;;  %s1609_s4 = inlined_call_operand.hbm [shape: f32[2,16,128], index: 4, kind: output, shape index: {}]  }
   0x1   :  { %1612 = sst [smem:[#allocation12_spill]] %s1606_s1 }
   0x2   :  { %9 = vsyncpa [#allocation3], 0 }
   0x3   :  { %11 = vsyncpa [#allocation3 + $0x1], 0 }
   0x4   :  { %12 = vsyncpa [#allocation6], 0 }
   0x5   :  { %13 = vsyncpa [#allocation4], 0 }
   0x6   :  { %15 = vsyncpa [#allocation4 + $0x1], 0  ;;  %s1382_s15 = smov 0   ;;  %s1384_s16 = smov 0  }
   0x7   :  { %s1386_s17 = smov 0   ;;  %s1388_s18 = smov 0  }
   0x8   :  { %s1390_s19 = smov 0   ;;  %s1392_s20 = smov 0  }
   0x9 LB: > { %s931_s21 = sadd.s32 4294967295, %s1346_s20   ;;  %s932_s22 = sadd.s32 4294967294, %s1346_s20   ;;  %s1346_s20 = sphi %s1392_s20, %s21_s20   ;;  %s1342_s19 = sphi %s1390_s19, %s1629_s19   ;;  %s1338_s18 = sphi %s1388_s18, %s1628_s18   ;;  %s1334_s17 = sphi %s1386_s17, %s1627_s17   ;;  %s1330_s16 = sphi %s1384_s16, %s1626_s16   ;;  %s1326_s15 = sphi %s1382_s15, %s1625_s15  }
   0xa   : > { %p55_p0 = scmp.ne.s32.totalorder %s1330_s16, %s1326_s15  ;;  %p1416_p1 = scmp.eq.s32.totalorder %s931_s21, 0 }
   0xb   : > { %p1420_p2 = scmp.eq.s32.totalorder %s931_s21, 1  ;;  %p150_p3 = scmp.eq.s32.totalorder %s932_s22, 1 }
   0xc   : > { %p1426_p4 = por %p1416_p1, %p55_p0  ;;  %p933_p5 = scmp.ge.s32.totalorder %s1346_s20, 1 }
   0xd   : > { %p1431_p6 = por %p150_p3, %p55_p0  ;;  %p157_p7 = scmp.lt.s32.totalorder %s1346_s20, 3 }
   0xe   : > { %s1348_s28 = smov [#allocation5]   ;;  %s1349_s5 = smov [#allocation7]  }
   0xf   : > { %p1436_p8 = pnand %p933_p5, %p157_p7  ;;  %s169_s29 = sshll.u32 %s1348_s28, 4  ;;  %s170_s29 = int_to_ptr.vmem [resolvable:$true] %s169_s29 }
  0x10   : > { %s182_s6 = sshll.u32 %s1349_s5, 4  ;;  %s1193_s7 = scalar_lea.vmem %s170_s29, 4096  ;;  %s183_s6 = int_to_ptr.vmem [resolvable:$true] %s182_s6 }
  0x11   : > { %p1053_p9 = pneg %p1436_p8  ;;  %p1194_p13 = scmp.ne.s32.totalorder %s170_s29, %s1193_s7 }
  0x12   : > { %p1201_p5 = scmp.lt.s32.totalorder %s170_s29, %s170_s29  ;;  %p1202_p7 = scmp.lt.s32.totalorder %s1193_s7, %s1193_s7 }
  0x13   : > { %p1445_p11 = pnand %p1053_p9, %p1416_p1 }
  0x14   : > { %p1203_p10 = por %p1202_p7, %p1201_p5 }
  0x15   : > { %p1184_p12 = pneg %p1445_p11 }
  0x17   : > { %p1196_p0 = pnand %p1194_p13, %p1184_p12 }
  0x19   : > { %p1197_p3 = pneg %p1196_p0 }
  0x1b   : > { %p1204_p9 = pnand %p1203_p10, %p1197_p3 }
  0x1d   : > { %1207 = shalt.err (!%p1204_p9)
}
  0x1e   : > { %s1610_s8 = smov 128   ;;  %s1611_s9 = smov 8  }
  0x1f   : > { %s1619_s1 = sld [smem:[#allocation12_spill]]  ;;  %s1219_s12 = scalar_lea.vmem %s183_s6, 2048 }
  0x20   : > { %p1220_p13 = scmp.ne.s32.totalorder %s183_s6, %s1219_s12  ;;  %p1227_p10 = scmp.lt.s32.totalorder %s183_s6, %s183_s6 }
  0x21   : > { %p1228_p3 = scmp.lt.s32.totalorder %s1219_s12, %s1219_s12 }
  0x22   : > { %p1222_p0 = pnand %p1220_p13, %p1184_p12 }
  0x23   : > { %p1229_p7 = por %p1228_p3, %p1227_p10 }
  0x24   : > { %p1223_p5 = pneg %p1222_p0 }
  0x25   : > { %1056 = dma.hbm_to_vmem [thread:$0]  (!%p1445_p11), %s1619_s1, 4096, %s170_s29, [#allocation6], %s1610_s8, %s1610_s8, %s1611_s9  }
  0x26   : > { %p1230_p9 = pnand %p1229_p7, %p1223_p5 }
  0x28   : > { %1233 = shalt.err (!%p1230_p9)
}
  0x29   : > { %1059 = dma.hbm_to_vmem [thread:$0]  (!%p1445_p11), %s1607_s2, 2048, %s183_s6, [#allocation6], %s1610_s8, %s1610_s8, %s1611_s9  }
  0x2a   : > { %s33_s21 = sadd.s32 1, %s1342_s19  ;;  %s42_s22 = sadd.s32 1, %s1334_s17 }
  0x2b   : > { %p35_p12 = scmp.ge.s32.totalorder %s33_s21, 2  ;;  %p49_p13 = scmp.ne.s32.totalorder %s1334_s17, %s1330_s16 }
  0x2c   : > { %p50_p0 = scmp.eq.s32.totalorder %s1346_s20, 0  ;;  %p1070_p5 = scmp.lt.s32.totalorder %s1346_s20, 2 }
  0x2d   : > { %s1631_s21 = smov (%p35_p12, %s33_s21), 0  ;;  %p1483_p3 = por %p1420_p2, %p49_p13 }
  0x2e   : > { %p51_p10 = por %p50_p0, %p49_p13  ;;  %s37_s29 = ssub.s32 %s1342_s19, %s1631_s21 }
  0x2f   : > { %s199_s30 = sand.u32 1, %s1334_s17   ;;  %p40_p7 = scmp.eq.s32.totalorder %s37_s29, 0 }
  0x30   : > { %s1038_s5 = smul.u32 24, %s199_s30  ;;  %p1490_p11 = pnand %p1070_p5, %p51_p10 }
  0x31   : > { %s1495_s7 = scalar_select %p40_p7, %s1334_s17, %s42_s22  }
  0x32   : > { %s1039_s10 = smul.u32 384, %s1342_s19  ;;  %s203_s11 = scalar_lea.vmem [#allocation2], %s1038_s5 }
  0x33   : > { %s212_s12 = sshll.u32 %s203_s11, 4  ;;  %s200_s8 = scalar_lea.sflag [#allocation3], %s199_s30  ;;  %s213_s12 = int_to_ptr.vmem [resolvable:$true] %s212_s12 }
  0x34   : > { %s211_s14 = scalar_lea.hbm %s1605_s0, %s1039_s10  ;;  %p1236_p2 = pneg %p1490_p11 }
  0x35   : > { %s1247_s29 = scalar_lea.vmem %s213_s12, 384  ;;  %s1352_s9 = smov [#allocation2]  }
  0x36   : > { %p1248_p9 = scmp.ne.s32.totalorder %s213_s12, %s1247_s29  ;;  %s1252_s1 = sshll.u32 %s1352_s9, 4  ;;  %s1253_s1 = int_to_ptr.vmem [resolvable:$false] %s1252_s1 }
  0x37   : > { %s1254_s22 = scalar_lea.vmem %s1253_s1, 768  ;;  %p1255_p0 = scmp.lt.s32.totalorder %s213_s12, %s1253_s1 }
  0x38   : > { %p1250_p12 = pnand %p1248_p9, %p1236_p2  ;;  %p1256_p5 = scmp.lt.s32.totalorder %s1254_s22, %s1247_s29 }
  0x3a   : > { %p1251_p13 = pneg %p1250_p12  ;;  %p1257_p10 = por %p1256_p5, %p1255_p0 }
  0x3c   : > { %p1258_p7 = pnand %p1257_p10, %p1251_p13 }
  0x3e   : > { %1261 = shalt.err (!%p1258_p7)
}
  0x3f   : > { %s1622_s5 = smov 8   ;;  %s1623_s10 = smov 128  }
  0x40   : > { %1063 = dma.hbm_to_vmem [thread:$0]  (!%p1490_p11), %s211_s14, 384, %s213_s12, %s200_s8, %s1623_s10, %s1623_s10, %s1622_s5  }
  0x41   : > { %224 = sbr.rel (%p1436_p8) target bundleno = 559 (0x22f), region = 36  ;;  %s1511_s30 = sand.u32 (!%p1436_p8), 1, %s1330_s16  }
  0x42   : > { %s1040_s1 = smul.u32 (!%p1436_p8), 24, %s1511_s30  ;;  %s227_s9 = scalar_lea.sflag (!%p1436_p8), [#allocation3], %s1511_s30 }
  0x44   : > { %s230_s11 = scalar_lea.vmem (!%p1436_p8), [#allocation2], %s1040_s1 }
  0x46   : > { %1313 = dma.done.wait (%p1426_p4), %s227_s9, 384  }
  0x47   : > { %1315 = vsyncadd (%p1426_p4), %s227_s9, 4294966912 }
  0x48   : > { %1317 = dma.done.wait (%p1416_p1), [#allocation6], 6144  }
  0x49   : > { %1319 = vsyncadd (%p1416_p1), [#allocation6], 4294961152  ;;  %v1353_v0 = vmov 0   ;;  %v1130_v1 = vld [vmem:[#allocation5 + $0x74] ss:$8 sps:$4 sm:$0xff]   ;;  %vm339_vm1 = vcmask 523264  }
  0x4a   : > { %375 = vmatprep.mubr.bf16.mxu1 %v1353_v0  ;;  %560 = vmatprep.mubr.bf16.mxu0 %v1353_v0  ;;  %v1132_v2 = vld [vmem:[#allocation5 + $0x70] ss:$8 sps:$4 sm:$0xff]   ;;  %v1133_v3 = vld [vmem:[#allocation5 + $0x64] ss:$8 sps:$4 sm:$0xff]   ;;  %v1135_v4 = vld [vmem:[#allocation5 + $0x60] ss:$8 sps:$4 sm:$0xff]  }
  0x4b   : > { %1129 = vset.pattern.permute.xlu0 %v1353_v0  ;;  %351 = vmatprep.subr.bf16.mxu1 %v1130_v1  ;;  %v1136_v5 = vld [vmem:[#allocation5 + $0x54] ss:$8 sps:$4 sm:$0xff]   ;;  %v1138_v10 = vld [vmem:[#allocation5 + $0x50] ss:$8 sps:$4 sm:$0xff]   ;;  %v1139_v11 = vld [vmem:[#allocation5 + $0x44] ss:$8 sps:$4 sm:$0xff]  }
  0x4c   : > { %352 = vmatpush1.bf16.msra.mxu1 %v1132_v2  ;;  %v265_v6 = vld [vmem:[%s230_s11] sm:$0xff]  ;;  %v266_v7 = vld [vmem:[%s230_s11 + $0x8] sm:$0xff]  ;;  %v267_v8 = vld [vmem:[%s230_s11 + $0x10] sm:$0xff]  ;;  %vm286_vm0 = vsmask.f32 7424  ;;  %vm481_vm2 = vcmask 1046528  }
  0x4d   : > { %353 = vmatprep.subr.bf16.mxu1 %v1133_v3  ;;  %v1526_v9 = vpack.c.bf16 %v266_v7, %v265_v6  ;;  %v1528_v12 = vpack.c.bf16 %v267_v8, %v267_v8  ;;  %v1145_v15 = vld [vmem:[#allocation5 + $0xb4] ss:$8 sps:$4 sm:$0xff]   ;;  %v1147_v17 = vld [vmem:[#allocation5 + $0xb0] ss:$8 sps:$4 sm:$0xff]   ;;  %v1141_v18 = vld [vmem:[#allocation5 + $0x40] ss:$8 sps:$4 sm:$0xff]  }
  0x4e   : > { %536 = vmatprep.subr.bf16.mxu0 %v1145_v15  ;;  %v1151_v21 = vld [vmem:[#allocation5 + $0xa4] ss:$8 sps:$4 sm:$0xff]   ;;  %v1153_v22 = vld [vmem:[#allocation5 + $0xa0] ss:$8 sps:$4 sm:$0xff]   ;;  %v1144_v24 = vld [vmem:[#allocation5 + $0x34] ss:$8 sps:$4 sm:$0xff]  }
  0x4f   : > { %v288_v13 = vshrl.u32 %v1526_v9, 16  ;;  %v290_v14 = vshll.u32 %v1526_v9, 16  ;;  %v295_v16 = vshll.u32 %v1528_v12, 16  ;;  %537 = vmatpush1.bf16.msra.mxu0 %v1147_v17  ;;  %v1142_v25 = vld [vmem:[#allocation5 + $0x30] ss:$8 sps:$4 sm:$0xff]   ;;  %v482_v33 = vrot.slane %v1526_v9, 1 }
  0x50   : > { %354 = vmatpush1.bf16.msra.mxu1 %v1135_v4  ;;  %538 = vmatprep.subr.bf16.mxu0 %v1151_v21  ;;  %v1157_v26 = vld [vmem:[#allocation5 + $0x94] ss:$8 sps:$4 sm:$0xff]   ;;  %v1150_v28 = vld [vmem:[#allocation5 + $0x24] ss:$8 sps:$4 sm:$0xff]   ;;  %v1159_v29 = vld [vmem:[#allocation5 + $0x90] ss:$8 sps:$4 sm:$0xff]  }
  0x51   : > { %355 = vmatprep.subr.bf16.mxu1 %v1136_v5  ;;  %v292_v19 = vrot.slane %v290_v14, 1  ;;  %v297_v20 = vrot.slane %v295_v16, 1  ;;  %v1163_v30 = vld [vmem:[#allocation5 + $0x84] ss:$8 sps:$4 sm:$0xff]   ;;  %v1148_v31 = vld [vmem:[#allocation5 + $0x20] ss:$8 sps:$4 sm:$0xff]  }
  0x52   : > { %v1165_v32 = vld [vmem:[#allocation5 + $0x80] ss:$8 sps:$4 sm:$0xff]   ;;  %v483_v34 = vrot.slane %v1528_v12, 1  ;;  %v1156_v35 = vld [vmem:[#allocation5 + $0x14] ss:$8 sps:$4 sm:$0xff]   ;;  %v587_v44 = vshrl.u32 %v1528_v12, 16 }
  0x53   : > { %v293_v23 = vor.u32 %v292_v19, %v288_v13  ;;  %539 = vmatpush1.bf16.msra.mxu0 %v1153_v22  ;;  %v1154_v36 = vld [vmem:[#allocation5 + $0x10] ss:$8 sps:$4 sm:$0xff]   ;;  %v1162_v38 = vld [vmem:[#allocation5 + $0x4] ss:$8 sps:$4 sm:$0xff]   ;;  %v1160_v39 = vld [vmem:[#allocation5] ss:$8 sps:$4 sm:$0xff]  }
  0x54   : > { %356 = vmatpush1.bf16.msra.mxu1 %v1138_v10  ;;  %540 = vmatprep.subr.bf16.mxu0 %v1157_v26  ;;  %v484_v37 = vsel %vm481_vm2, %v482_v33, %v483_v34  ;;  %v1168_v40 = vld [vmem:[#allocation5 + $0xf4] ss:$8 sps:$4 sm:$0xff]   ;;  %v1166_v41 = vld [vmem:[#allocation5 + $0xf0] ss:$8 sps:$4 sm:$0xff]   ;;  %v1171_v42 = vld [vmem:[#allocation5 + $0xe4] ss:$8 sps:$4 sm:$0xff]  }
  0x55   : > { %357 = vmatprep.subr.bf16.mxu1 %v1139_v11  ;;  %v298_v27 = vsel %vm286_vm0, %v293_v23, %v297_v20  ;;  %v1169_v43 = vld [vmem:[#allocation5 + $0xe0] ss:$8 sps:$4 sm:$0xff]   ;;  %v1174_v45 = vld [vmem:[#allocation5 + $0xd4] ss:$8 sps:$4 sm:$0xff]   ;;  %v584_v46 = vrot.slane %v288_v13, 1  ;;  %v590_v47 = vrot.slane %v295_v16, 2 }
  0x56   : > { %v1172_v48 = vld [vmem:[#allocation5 + $0xd0] ss:$8 sps:$4 sm:$0xff]   ;;  %v585_v49 = vrot.slane %v290_v14, 2  ;;  %v589_v50 = vrot.slane %v587_v44, 1  ;;  %v1177_v51 = vld [vmem:[#allocation5 + $0xc4] ss:$8 sps:$4 sm:$0xff]  }
  0x57   : > { %541 = vmatpush1.bf16.msra.mxu0 %v1159_v29  ;;  %v1175_v52 = vld [vmem:[#allocation5 + $0xc0] ss:$8 sps:$4 sm:$0xff]   ;;  %vm583_vm3 = vsmask.f32 6400  ;;  %v704_v56 = vld [vmem:[#allocation7 + $0x78] sm:$0xff]  ;;  %v703_v57 = vld [vmem:[#allocation7 + $0x70] sm:$0xff] }
  0x58   : > { %358 = vmatpush1.bf16.msra.mxu1 %v1141_v18  ;;  %542 = vmatprep.subr.bf16.mxu0 %v1163_v30  ;;  %v586_v53 = vor.u32 %v585_v49, %v584_v46  ;;  %v591_v54 = vor.u32 %v590_v47, %v589_v50  ;;  %v702_v58 = vld [vmem:[#allocation7 + $0x68] sm:$0xff]  ;;  %v701_v59 = vld [vmem:[#allocation7 + $0x60] sm:$0xff]  ;;  %v700_v60 = vld [vmem:[#allocation7 + $0x58] sm:$0xff]  ;;  %s941_s27 = sshll.u32 %s1511_s30, 4  ;;  %s984_s12 = sshll.u32 %s1338_s18, 8 }
  0x59   : > { %436 = vmatprep.subr.bf16.mxu1 %v1144_v24  ;;  %v699_v61 = vld [vmem:[#allocation7 + $0x50] sm:$0xff]  ;;  %v698_v62 = vld [vmem:[#allocation7 + $0x48] sm:$0xff]  ;;  %v697_v63 = vld [vmem:[#allocation7 + $0x40] sm:$0xff]  ;;  %s262_s8 = scalar_lea.vmem [#allocation8], %s941_s27  ;;  %s1557_s14 = scalar_lea.hbm %s1609_s4, %s984_s12 }
  0x5a   : > { %v592_v55 = vsel %vm583_vm3, %v586_v53, %v591_v54  ;;  %v695_v1 = vld [vmem:[#allocation7 + $0x30] sm:$0xff]  ;;  %v694_v2 = vld [vmem:[#allocation7 + $0x28] sm:$0xff]  ;;  %v693_v3 = vld [vmem:[#allocation7 + $0x20] sm:$0xff]  ;;  %s825_s6 = sshll.u32 %s262_s8, 4  ;;  %s810_s29 = scalar_lea.sflag [#allocation4], %s1511_s30  ;;  %s1552_s6 = int_to_ptr.vmem [resolvable:$true] %s825_s6 }
  0x5b   : > { %950 = vmatmul.mubr.msk.bf16.vlgmr.msra.gmra.mxu1 %vm339_vm1, %v298_v27  ;;  %543 = vmatpush1.bf16.msra.mxu0 %v1165_v32  ;;  %v692_v4 = vld [vmem:[#allocation7 + $0x18] sm:$0xff]  ;;  %v691_v5 = vld [vmem:[#allocation7 + $0x10] sm:$0xff]  ;;  %v690_v6 = vld [vmem:[#allocation7 + $0x8] sm:$0xff]  ;;  %s1262_s22 = scalar_lea.vmem %s1552_s6, 256  ;;  %s1354_s18 = smov [#allocation8]  }
  0x5c   : > { %437 = vmatpush1.bf16.msra.mxu1 %v1142_v25  ;;  %460 = vmatprep.mubr.bf16.mxu1 %v1353_v0  ;;  %v689_v7 = vld [vmem:[#allocation7] sm:$0xff]  ;;  %v978_v44 = vld [vmem:[%s1608_s3] ss:$0 sm:$0xff]  ;;  %p1263_p1 = scmp.ne.s32.totalorder %s1552_s6, %s1262_s22  ;;  %s1266_s5 = sshll.u32 %s1354_s18, 4  ;;  %s1267_s5 = int_to_ptr.vmem [resolvable:$false] %s1266_s5 }
  0x5d   : > { %438 = vmatprep.subr.bf16.mxu1 %v1150_v28  ;;  %1003 = vmatprep.subr.mxu0 %v704_v56  ;;  %s1268_s10 = scalar_lea.vmem %s1267_s5, 512  ;;  %p1269_p11 = scmp.lt.s32.totalorder %s1552_s6, %s1267_s5 }
  0x5e   : > { %968 = vmatmul.mubr.msk.bf16.vlgmr.msra.gmra.mxu0 %vm339_vm1, %v484_v37  ;;  %p1264_p4 = pnand %p1263_p1, %p1483_p3  ;;  %p1270_p2 = scmp.lt.s32.totalorder %s1268_s10, %s1262_s22 }
  0x5f   : > { %1004 = vmatpush3.msra.mxu0 %v704_v56 }
  0x60   : > { %439 = vmatpush1.bf16.msra.mxu1 %v1148_v31  ;;  %1005 = vmatprep.subr.mxu0 %v703_v57  ;;  %p1265_p8 = pneg %p1264_p4  ;;  %p1271_p9 = por %p1270_p2, %p1269_p11 }
  0x61   : > { %440 = vmatprep.subr.bf16.mxu1 %v1156_v35  ;;  %1006 = vmatpush3.msra.mxu0 %v703_v57 }
  0x62   : > { %1007 = vmatprep.subr.mxu0 %v702_v58  ;;  %p1272_p12 = pnand %p1271_p9, %p1265_p8 }
  0x63   : > { %1008 = vmatpush3.msra.mxu0 %v702_v58 }
  0x64   : > { %441 = vmatpush1.bf16.msra.mxu1 %v1154_v36  ;;  %1009 = vmatprep.subr.mxu0 %v701_v59 }
  0x65   : > { %442 = vmatprep.subr.bf16.mxu1 %v1162_v38  ;;  %1010 = vmatpush3.msra.mxu0 %v701_v59 }
  0x66   : > { %1011 = vmatprep.subr.mxu0 %v700_v60 }
  0x67   : > { %1012 = vmatpush3.msra.mxu0 %v700_v60 }
  0x68   : > { %443 = vmatpush1.bf16.msra.mxu1 %v1160_v39  ;;  %1013 = vmatprep.subr.mxu0 %v699_v61 }
  0x69   : > { %644 = vmatprep.subr.bf16.mxu1 %v1168_v40  ;;  %1014 = vmatpush3.msra.mxu0 %v699_v61 }
  0x6a   : > { %1015 = vmatprep.subr.mxu0 %v698_v62 }
  0x6b   : > { %959 = vmatmul.mubr.msk.bf16.vlgmr.msra.gmra.mxu1 %vm339_vm1, %v1526_v9  ;;  %1016 = vmatpush3.msra.mxu0 %v698_v62 }
  0x6c   : > { %645 = vmatpush1.bf16.msra.mxu1 %v1166_v41  ;;  %668 = vmatprep.mubr.bf16.mxu1 %v1353_v0  ;;  %v696_v0 = vld [vmem:[#allocation7 + $0x38] sm:$0xff] }
  0x6d   : > { %646 = vmatprep.subr.bf16.mxu1 %v1171_v42  ;;  %1017 = vmatprep.subr.mxu0 %v697_v63 }
  0x6e   : > { %1018 = vmatpush3.msra.mxu0 %v697_v63 }
  0x6f   : > { %1019 = vmatprep.subr.mxu0 %v696_v0 }
  0x70   : > { %647 = vmatpush1.bf16.msra.mxu1 %v1169_v43  ;;  %1020 = vmatpush3.msra.mxu0 %v696_v0 }
  0x71   : > { %648 = vmatprep.subr.bf16.mxu1 %v1174_v45  ;;  %1021 = vmatprep.subr.mxu0 %v695_v1 }
  0x72   : > { %1022 = vmatpush3.msra.mxu0 %v695_v1 }
  0x73   : > { %1023 = vmatprep.subr.mxu0 %v694_v2 }
  0x74   : > { %649 = vmatpush1.bf16.msra.mxu1 %v1172_v48  ;;  %1024 = vmatpush3.msra.mxu0 %v694_v2 }
  0x75   : > { %650 = vmatprep.subr.bf16.mxu1 %v1177_v51  ;;  %1025 = vmatprep.subr.mxu0 %v693_v3 }
  0x76   : > { %1026 = vmatpush3.msra.mxu0 %v693_v3 }
  0x77   : > { %1027 = vmatprep.subr.mxu0 %v692_v4 }
  0x78   : > { %651 = vmatpush1.bf16.msra.mxu1 %v1175_v52  ;;  %1028 = vmatpush3.msra.mxu0 %v692_v4 }
  0x79   : > { %1029 = vmatprep.subr.mxu0 %v691_v5 }
  0x7a   : > { %1030 = vmatpush3.msra.mxu0 %v691_v5 }
  0x7b   : > { %977 = vmatmul.mubr.msk.bf16.vlgmr.msra.gmra.mxu1 %vm339_vm1, %v592_v55  ;;  %1031 = vmatprep.subr.mxu0 %v690_v6 }
  0x7c   : > { %1032 = vmatpush3.msra.mxu0 %v690_v6 }
  0x7d   : > { %1033 = vmatprep.subr.mxu0 %v689_v7 }
  0x7e   : > { %1034 = vmatpush3.msra.mxu0 %v689_v7 }
 0x11b   : > { %v377_v8 = vpop.f32.mrf.mxu1 }
 0x11d   : > { %v379_v9 = vpop.f32.mrf.mxu1 }
 0x11e   : > { %v562_v14 = vpop.f32.mrf.mxu0 }
 0x11f   : > { %v381_v10 = vpop.f32.mrf.mxu1 }
 0x120   : > { %v564_v16 = vpop.f32.mrf.mxu0 }
 0x121   : > { %v383_v11 = vpop.f32.mrf.mxu1 }
 0x122   : > { %v566_v20 = vpop.f32.mrf.mxu0 }
 0x124   : > { %v568_v27 = vpop.f32.mrf.mxu0 }
 0x12b   : > { %v462_v12 = vpop.f32.mrf.mxu1 }
 0x12c   : > { %v463_v17 = vadd.f32 %v462_v12, %v377_v8 }
 0x12d   : > { %v464_v13 = vpop.f32.mrf.mxu1 }
 0x12e   : > { %v465_v18 = vadd.f32 %v464_v13, %v379_v9  ;;  %v571_v21 = vadd.f32 %v562_v14, %v463_v17 }
 0x12f   : > { %v466_v15 = vpop.f32.mrf.mxu1 }
 0x130   : > { %v467_v22 = vadd.f32 %v466_v15, %v381_v10  ;;  %v572_v24 = vadd.f32 %v564_v16, %v465_v18 }
 0x131   : > { %v468_v19 = vpop.f32.mrf.mxu1 }
 0x132   : > { %v469_v25 = vadd.f32 %v468_v19, %v383_v11  ;;  %v573_v29 = vadd.f32 %v566_v20, %v467_v22 }
 0x134   : > { %v574_v32 = vadd.f32 %v568_v27, %v469_v25 }
 0x13b   : > { %v670_v23 = vpop.f32.mrf.mxu1 }
 0x13c   : > { %v679_v26 = vadd.f32 %v670_v23, %v571_v21 }
 0x13d   : > { %v672_v28 = vpop.f32.mrf.mxu1 }
 0x13e   : > { %v680_v30 = vadd.f32 %v672_v28, %v572_v24  ;;  %v683_v33 = vmul.f32 %v679_v26, %v679_v26 }
 0x13f   : > { %v674_v31 = vpop.f32.mrf.mxu1 }
 0x140   : > { %v685_v34 = vmul.f32 %v680_v30, %v680_v30  ;;  %v681_v35 = vadd.f32 %v674_v31, %v573_v29 }
 0x141   : > { %v676_v36 = vpop.f32.mrf.mxu1 }
 0x142   : > { %v687_v37 = vadd.f32 %v685_v34, %v683_v33  ;;  %v682_v38 = vadd.f32 %v676_v36, %v574_v32  ;;  %708 = vperm.xlu0 %1129, %v685_v34   ;;  %v684_v39 = vmul.f32 %v681_v35, %v681_v35 }
 0x144   : > { %v686_v40 = vmul.f32 %v682_v38, %v682_v38  ;;  %1035 = vmatprep.mubr.f32.mxu0 %v687_v37 }
 0x146   : > { %v688_v41 = vadd.f32 %v686_v40, %v684_v39  ;;  %713 = vperm.xlu0 %1129, %v686_v40  }
 0x148   : > { %1036 = vmatmul.mubr.f32.vlgmr.msra.gmra.mxu0 %v688_v41 }
 0x1bd   : > { %v709_v42 = vpop.permute.xlu0 %708 }
 0x1be   : > { %v722_v47 = vmul.f32 %v978_v44, %v709_v42 }
 0x1c1   : > { %v714_v43 = vpop.permute.xlu0 %713 }
 0x1c2   : > { %v723_v45 = vmul.f32 %v978_v44, %v714_v43 }
 0x208   : > { %v1037_v46 = vpop.f32.mrf.mxu0 }
 0x209   : > { %v796_v48 = vadd.f32 %v1037_v46, %v723_v45 }
 0x20a   : > { %v790_v49 = vpop.f32.mrf.mxu0 }
 0x20b   : > { %v800_v50 = vmax.f32 %v796_v48, 1e-05  ;;  %v791_v51 = vadd.f32 %v790_v49, %v722_v47 }
 0x20d   : > { %1178 = vlog2.f32 %v800_v50  ;;  %v799_v52 = vmax.f32 %v791_v51, 1e-05 }
 0x20f   : > { %1180 = vlog2.f32 %v799_v52 }
 0x21a   : > { %v1179_v53 = vpop.eup %1178 }
 0x21b   : > { %v804_v54 = vmul.f32 0.6931472, %v1179_v53 }
 0x21c   : > { %v1181_v55 = vpop.eup %1180 }
 0x21d   : > { %v806_v56 = vmul.f32 0.4342945, %v804_v54  ;;  %v802_v57 = vmul.f32 0.6931472, %v1181_v55 }
 0x21f   : > { %808 = vst [vmem:[%s262_s8 + $0x8] sm:$0xff] %v806_v56  ;;  %v805_v58 = vmul.f32 0.4342945, %v802_v57 }
 0x221   : > { %807 = vst [vmem:[%s262_s8] sm:$0xff] %v805_v58 }
 0x222   : > { %1275 = shalt.err (!%p1272_p12)
}
 0x223   : > { %s1276_s1 = scalar_lea.hbm %s1557_s14, 256  ;;  %s1280_s23 = scalar_lea.hbm %s1609_s4, 512 }
 0x224   : > { %p1277_p13 = scmp.ne.s32.totalorder %s1557_s14, %s1276_s1  ;;  %p1281_p10 = scmp.lt.s32.totalorder %s1557_s14, %s1609_s4 }
 0x225   : > { %p1282_p7 = scmp.lt.s32.totalorder %s1280_s23, %s1276_s1 }
 0x226   : > { %p1278_p0 = pnand %p1277_p13, %p1483_p3 }
 0x227   : > { %p1283_p1 = por %p1282_p7, %p1281_p10 }
 0x228   : > { %p1279_p5 = pneg %p1278_p0 }
 0x22a   : > { %p1284_p4 = pnand %p1283_p1, %p1279_p5 }
 0x22c   : > { %1287 = shalt.err (!%p1284_p4)
}
 0x22d   : > { %s1355_s8 = smov 128   ;;  %s1356_s12 = smov 8  }
 0x22e   : > { %1051 = dma.vmem_to_hbm [thread:$0]  (%p1483_p3), %s1552_s6, 256, %s1557_s14, %s810_s29, %s1355_s8, %s1355_s8, %s1356_s12  }
 0x22f PF: > { %s840_s13 = sand.u32 1, %s1326_s15   ;;  %p1624_p8 = scmp.ge.s32.totalorder %s1346_s20, 2 }
 0x230   : > { %s841_s24 = scalar_lea.sflag [#allocation4], %s840_s13 }
 0x231   : > { %p1065_p11 = pnand %p1624_p8, %p1431_p6 }
 0x233   : > { %p1066_p2 = pneg %p1065_p11 }
 0x235   : > { %1321 = dma.done.wait (%p1066_p2), %s841_s24, 256  }
 0x236   : > { %1323 = vsyncadd (%p1066_p2), %s841_s24, 4294967040  ;;  %s21_s20 = sadd.s32 1, %s1346_s20   ;;  %s1625_s15 = smov %s1330_s16 }
 0x237   : > { %p18_p9 = scmp.ge.s32.totalorder %s21_s20, 4   ;;  %s1626_s16 = smov %s1334_s17 }
 0x238   : > { %s1627_s17 = smov %s1495_s7  ;;  %s1628_s18 = smov %s1342_s19 }
 0x239   : > { %s1629_s19 = smov %s1631_s21  ;;  %20 = sbr.rel (!%p18_p9) target bundleno = 9 (0x9), region = 89 }
 0x23e   :  { %846 = vsyncpa [#allocation3], 1 }
 0x23f   :  { %848 = vsyncpa [#allocation3 + $0x1], 1 }
 0x240   :  { %849 = vsyncpa [#allocation6], 1 }
 0x241   :  { %850 = vsyncpa [#allocation4], 1 }
 0x242   :  { %852 = vsyncpa [#allocation4 + $0x1], 1 }

</bundles_post_ra>
